<compile_context>
chip_gen: v6e
topology: v6e:2x2x1
jax: 0.10.0
libtpu: 0.0.40
codegen_flags: <defaults>
</compile_context>

<pallas_src>
import jax
import jax.numpy as jnp
from jax.experimental import pallas as pl
from jax.experimental.pallas import tpu as pltpu

EPS = 1e-5


# ------------------------------- fused kernel -------------------------------


def gnn_fused_kernel(
    x_ref, adj_ref,
    w1r_ref, w1o_ref, b1_ref, g1_ref, be1_ref,
    w2r_ref, w2o_ref, b2_ref, g2_ref, be2_ref,
    w3r_ref, w3o_ref, b3_ref, g3_ref, be3_ref,
    wl1_ref, wl2_ref, wl3_ref, bl_ref,
    o_ref,
):
    x = x_ref[...]                      # [BN, F_in]
    adj = adj_ref[...]                  # [BN, BN] block-diagonal

    # degree (row sum, clamped to >= 1) computed once and reused by all 3 layers
    deg = jnp.maximum(jnp.sum(adj, axis=-1, keepdims=True), 1.0)

    def sage(h, w_rel, w_root, b):
        agg = jnp.dot(adj, h, preferred_element_type=jnp.float32)
        agg = agg / deg
        return (jnp.dot(agg, w_rel, preferred_element_type=jnp.float32)
                + jnp.dot(h, w_root, preferred_element_type=jnp.float32)
                + b)

    def bn(h, gamma, beta):
        # BatchNorm1d training forward over all rows; single-pass mean / E[x^2].
        m = jnp.mean(h, axis=0, keepdims=True)
        ex2 = jnp.mean(h * h, axis=0, keepdims=True)
        var = jnp.maximum(ex2 - m * m, 0.0)
        return (h - m) * jax.lax.rsqrt(var + EPS) * gamma + beta

    relu = lambda v: jnp.maximum(v, 0.0)

    x1 = bn(relu(sage(x,  w1r_ref[...], w1o_ref[...], b1_ref[...])), g1_ref[...], be1_ref[...])
    x2 = bn(relu(sage(x1, w2r_ref[...], w2o_ref[...], b2_ref[...])), g2_ref[...], be2_ref[...])
    x3 = bn(relu(sage(x2, w3r_ref[...], w3o_ref[...], b3_ref[...])), g3_ref[...], be3_ref[...])

    # concat([x1,x2,x3]) @ W_lin  ==  x1 @ Wl1 + x2 @ Wl2 + x3 @ Wl3
    out = (jnp.dot(x1, wl1_ref[...], preferred_element_type=jnp.float32)
           + jnp.dot(x2, wl2_ref[...], preferred_element_type=jnp.float32)
           + jnp.dot(x3, wl3_ref[...], preferred_element_type=jnp.float32)
           + bl_ref[...])
    o_ref[...] = relu(out)


# ------------------------------ wrapper (JAX) --------------------------------


def gnn_forward(params, x, adj):
    """x: [B, N, F_in], adj: [B, N, N] dense. Returns [B, N, out_channels]."""
    B, N, f_in = x.shape
    hidden = params["w1_rel"].shape[1]
    out_ch = params["b_lin"].shape[-1]

    x2d = x.reshape(B * N, f_in)
    # exact equivalence: per-graph dense adjacency -> one block-diagonal matrix
    adj_bd = jax.scipy.linalg.block_diag(*[adj[i] for i in range(B)])

    wl = params["w_lin"]
    wl1, wl2, wl3 = wl[:hidden], wl[hidden:2 * hidden], wl[2 * hidden:]

    args = (
        x2d, adj_bd,
        params["w1_rel"], params["w1_root"], params["b1"], params["g1"], params["be1"],
        params["w2_rel"], params["w2_root"], params["b2"], params["g2"], params["be2"],
        params["w3_rel"], params["w3_root"], params["b3"], params["g3"], params["be3"],
        wl1, wl2, wl3, params["b_lin"],
    )

    out2d = pl.pallas_call(
        gnn_fused_kernel,
        out_shape=jax.ShapeDtypeStruct((B * N, out_ch), jnp.float32),
        in_specs=[pl.BlockSpec(memory_space=pltpu.MemorySpace.VMEM)] * len(args),
        out_specs=pl.BlockSpec(memory_space=pltpu.MemorySpace.VMEM),
    )(*args)
    return out2d.reshape(B, N, out_ch)


# --------------------------- pure-JAX reference ------------------------------


def gnn_reference(params, x, adj):
    """Faithful (batched, two-pass BN) re-implementation of the PyTorch forward."""
    def sage(h, w_rel, w_root, b):
        agg = jnp.einsum("bij,bjc->bic", adj, h)
        deg = jnp.maximum(jnp.sum(adj, axis=-1, keepdims=True), 1.0)
        agg = agg / deg
        return jnp.einsum("bnc,co->bno", agg, w_rel) + jnp.einsum("bnc,co->bno", h, w_root) + b

    def bn(h, gamma, beta):
        B, N, C = h.shape
        hf = h.reshape(B * N, C)
        m = hf.mean(axis=0, keepdims=True)
        v = ((hf - m) ** 2).mean(axis=0, keepdims=True)
        hn = (hf - m) / jnp.sqrt(v + EPS) * gamma + beta
        return hn.reshape(B, N, C)

    x1 = bn(jax.nn.relu(sage(x,  params["w1_rel"], params["w1_root"], params["b1"])),
            params["g1"], params["be1"])
    x2 = bn(jax.nn.relu(sage(x1, params["w2_rel"], params["w2_root"], params["b2"])),
            params["g2"], params["be2"])
    x3 = bn(jax.nn.relu(sage(x2, params["w3_rel"], params["w3_root"], params["b3"])),
            params["g3"], params["be3"])
    cat = jnp.concatenate([x1, x2, x3], axis=-1)
    return jax.nn.relu(cat @ params["w_lin"] + params["b_lin"])


# --------------------------------- params ------------------------------------


def init_params(key, f_in, hidden, out_ch):
    ks = jax.random.split(key, 10)

    def unif(k, shape, fan_in):
        s = 1.0 / (fan_in ** 0.5)
        return jax.random.uniform(k, shape, jnp.float32, -s, s)

    ones = lambda c: jnp.ones((1, c), jnp.float32)
    zeros = lambda c: jnp.zeros((1, c), jnp.float32)

    return {
        # conv1: DenseSAGEConv(f_in -> hidden); weights stored [in, out]
        "w1_rel": unif(ks[0], (f_in, hidden), f_in),
        "w1_root": unif(ks[1], (f_in, hidden), f_in),
        "b1": unif(ks[2], (1, hidden), f_in),
        "g1": ones(hidden), "be1": zeros(hidden),        # fresh BatchNorm1d
        # conv2: hidden -> hidden
        "w2_rel": unif(ks[3], (hidden, hidden), hidden),
        "w2_root": unif(ks[4], (hidden, hidden), hidden),
        "b2": unif(ks[5], (1, hidden), hidden),
        "g2": ones(hidden), "be2": zeros(hidden),
        # conv3: hidden -> out_ch
        "w3_rel": unif(ks[6], (hidden, out_ch), hidden),
        "w3_root": unif(ks[7], (hidden, out_ch), hidden),
        "b3": unif(ks[8], (1, out_ch), hidden),
        "g3": ones(out_ch), "be3": zeros(out_ch),
        # final Linear(2*hidden + out_ch -> out_ch)
        "w_lin": unif(ks[9], (2 * hidden + out_ch, out_ch), 2 * hidden + out_ch),
        "b_lin": zeros(out_ch),
    }


# ----------------------------------- main -------------------------------------

if __name__ == "__main__":
    B, N = 2, 16
    F_IN, HIDDEN, OUT = 8, 32, 32

    key = jax.random.PRNGKey(0)
    kx, ka, kp = jax.random.split(key, 3)

    # node features [B, N, F_in]
    x = jax.random.normal(kx, (B, N, F_IN), jnp.float32)

    # random symmetric 0/1 dense adjacency per graph, no self loops
    probs = jax.random.uniform(ka, (B, N, N))
    adj = (probs < 0.3).astype(jnp.float32)
    adj = jnp.maximum(adj, jnp.transpose(adj, (0, 2, 1)))
    adj = adj * (1.0 - jnp.eye(N, dtype=jnp.float32))[None]

    params = init_params(kp, F_IN, HIDDEN, OUT)

    out = gnn_forward(params, x, adj)
    out = jax.block_until_ready(out)

    ref = gnn_reference(params, x, adj)
    assert out.shape == (B, N, OUT)
    assert bool(jnp.all(out >= 0.0))                       # final relu
    assert jnp.allclose(out, ref, atol=1e-4, rtol=1e-4)

    print("KERNEL_OK")
</pallas_src>

<mosaic_0001>
module attributes {stable_mosaic.version = 11 : i64} {
  func.func @gnn_fused_kernel(%arg0: memref<32x8xf32, #tpu.memory_space<vmem>>, %arg1: memref<32x32xf32, #tpu.memory_space<vmem>>, %arg2: memref<8x32xf32, #tpu.memory_space<vmem>>, %arg3: memref<8x32xf32, #tpu.memory_space<vmem>>, %arg4: memref<1x32xf32, #tpu.memory_space<vmem>>, %arg5: memref<1x32xf32, #tpu.memory_space<vmem>>, %arg6: memref<1x32xf32, #tpu.memory_space<vmem>>, %arg7: memref<32x32xf32, #tpu.memory_space<vmem>>, %arg8: memref<32x32xf32, #tpu.memory_space<vmem>>, %arg9: memref<1x32xf32, #tpu.memory_space<vmem>>, %arg10: memref<1x32xf32, #tpu.memory_space<vmem>>, %arg11: memref<1x32xf32, #tpu.memory_space<vmem>>, %arg12: memref<32x32xf32, #tpu.memory_space<vmem>>, %arg13: memref<32x32xf32, #tpu.memory_space<vmem>>, %arg14: memref<1x32xf32, #tpu.memory_space<vmem>>, %arg15: memref<1x32xf32, #tpu.memory_space<vmem>>, %arg16: memref<1x32xf32, #tpu.memory_space<vmem>>, %arg17: memref<32x32xf32, #tpu.memory_space<vmem>>, %arg18: memref<32x32xf32, #tpu.memory_space<vmem>>, %arg19: memref<32x32xf32, #tpu.memory_space<vmem>>, %arg20: memref<1x32xf32, #tpu.memory_space<vmem>>, %arg21: memref<32x32xf32, #tpu.memory_space<vmem>>) attributes {dimension_semantics = [], scalar_prefetch = 0 : i64, scratch_operands = 0 : i64, tpu.core_type = #tpu.core_type<tc>} {
    %c0 = arith.constant 0 : index
    %c0_0 = arith.constant 0 : index
    %0 = vector.load %arg0[%c0, %c0_0] : memref<32x8xf32, #tpu.memory_space<vmem>>, vector<32x8xf32>
    %c0_1 = arith.constant 0 : index
    %c0_2 = arith.constant 0 : index
    %1 = vector.load %arg1[%c0_1, %c0_2] : memref<32x32xf32, #tpu.memory_space<vmem>>, vector<32x32xf32>
    %cst = arith.constant dense<0.000000e+00> : vector<32xf32>
    %2 = vector.multi_reduction <add>, %1, %cst [1] : vector<32x32xf32> to vector<32xf32>
    %3 = vector.shape_cast %2 : vector<32xf32> to vector<32x1xf32>
    %cst_3 = arith.constant 1.000000e+00 : f32
    %4 = vector.broadcast %cst_3 : f32 to vector<32x1xf32>
    %5 = arith.maximumf %3, %4 : vector<32x1xf32>
    %c0_4 = arith.constant 0 : index
    %c0_5 = arith.constant 0 : index
    %6 = vector.load %arg2[%c0_4, %c0_5] : memref<8x32xf32, #tpu.memory_space<vmem>>, vector<8x32xf32>
    %c0_6 = arith.constant 0 : index
    %c0_7 = arith.constant 0 : index
    %7 = vector.load %arg3[%c0_6, %c0_7] : memref<8x32xf32, #tpu.memory_space<vmem>>, vector<8x32xf32>
    %c0_8 = arith.constant 0 : index
    %c0_9 = arith.constant 0 : index
    %8 = vector.load %arg4[%c0_8, %c0_9] : memref<1x32xf32, #tpu.memory_space<vmem>>, vector<1x32xf32>
    %cst_10 = arith.constant dense<0.000000e+00> : vector<32x8xf32>
    %9 = tpu.matmul %1, %0, %cst_10 {dimension_numbers = #tpu.dot_dimension_numbers<[1], [0], [0], [1], [0, 0, 1, 1], [], []>} : vector<32x32xf32>, vector<32x8xf32>, vector<32x8xf32> -> vector<32x8xf32>
    %10 = vector.broadcast %5 : vector<32x1xf32> to vector<32x8xf32>
    %11 = arith.divf %9, %10 : vector<32x8xf32>
    %cst_11 = arith.constant dense<0.000000e+00> : vector<32x32xf32>
    %12 = tpu.matmul %11, %6, %cst_11 {dimension_numbers = #tpu.dot_dimension_numbers<[1], [0], [0], [1], [0, 0, 1, 1], [], []>} : vector<32x8xf32>, vector<8x32xf32>, vector<32x32xf32> -> vector<32x32xf32>
    %cst_12 = arith.constant dense<0.000000e+00> : vector<32x32xf32>
    %13 = tpu.matmul %0, %7, %cst_12 {dimension_numbers = #tpu.dot_dimension_numbers<[1], [0], [0], [1], [0, 0, 1, 1], [], []>} : vector<32x8xf32>, vector<8x32xf32>, vector<32x32xf32> -> vector<32x32xf32>
    %14 = arith.addf %12, %13 : vector<32x32xf32>
    %15 = vector.broadcast %8 : vector<1x32xf32> to vector<32x32xf32>
    %16 = arith.addf %14, %15 : vector<32x32xf32>
    %cst_13 = arith.constant 0.000000e+00 : f32
    %17 = vector.broadcast %cst_13 : f32 to vector<32x32xf32>
    %18 = arith.maximumf %16, %17 : vector<32x32xf32>
    %c0_14 = arith.constant 0 : index
    %c0_15 = arith.constant 0 : index
    %19 = vector.load %arg5[%c0_14, %c0_15] : memref<1x32xf32, #tpu.memory_space<vmem>>, vector<1x32xf32>
    %c0_16 = arith.constant 0 : index
    %c0_17 = arith.constant 0 : index
    %20 = vector.load %arg6[%c0_16, %c0_17] : memref<1x32xf32, #tpu.memory_space<vmem>>, vector<1x32xf32>
    %cst_18 = arith.constant dense<0.000000e+00> : vector<32xf32>
    %21 = vector.multi_reduction <add>, %18, %cst_18 [0] : vector<32x32xf32> to vector<32xf32>
    %22 = vector.shape_cast %21 : vector<32xf32> to vector<1x32xf32>
    %cst_19 = arith.constant 3.200000e+01 : f32
    %23 = vector.broadcast %cst_19 : f32 to vector<1x32xf32>
    %24 = arith.divf %22, %23 : vector<1x32xf32>
    %25 = arith.mulf %18, %18 : vector<32x32xf32>
    %cst_20 = arith.constant dense<0.000000e+00> : vector<32xf32>
    %26 = vector.multi_reduction <add>, %25, %cst_20 [0] : vector<32x32xf32> to vector<32xf32>
    %27 = vector.shape_cast %26 : vector<32xf32> to vector<1x32xf32>
    %cst_21 = arith.constant 3.200000e+01 : f32
    %28 = vector.broadcast %cst_21 : f32 to vector<1x32xf32>
    %29 = arith.divf %27, %28 : vector<1x32xf32>
    %30 = arith.mulf %24, %24 : vector<1x32xf32>
    %31 = arith.subf %29, %30 : vector<1x32xf32>
    %cst_22 = arith.constant 0.000000e+00 : f32
    %32 = vector.broadcast %cst_22 : f32 to vector<1x32xf32>
    %33 = arith.maximumf %31, %32 : vector<1x32xf32>
    %34 = vector.broadcast %24 : vector<1x32xf32> to vector<32x32xf32>
    %35 = arith.subf %18, %34 : vector<32x32xf32>
    %cst_23 = arith.constant 9.99999974E-6 : f32
    %36 = vector.broadcast %cst_23 : f32 to vector<1x32xf32>
    %37 = arith.addf %33, %36 : vector<1x32xf32>
    %38 = math.rsqrt %37 : vector<1x32xf32>
    %39 = vector.broadcast %38 : vector<1x32xf32> to vector<32x32xf32>
    %40 = arith.mulf %35, %39 : vector<32x32xf32>
    %41 = vector.broadcast %19 : vector<1x32xf32> to vector<32x32xf32>
    %42 = arith.mulf %40, %41 : vector<32x32xf32>
    %43 = vector.broadcast %20 : vector<1x32xf32> to vector<32x32xf32>
    %44 = arith.addf %42, %43 : vector<32x32xf32>
    %c0_24 = arith.constant 0 : index
    %c0_25 = arith.constant 0 : index
    %45 = vector.load %arg7[%c0_24, %c0_25] : memref<32x32xf32, #tpu.memory_space<vmem>>, vector<32x32xf32>
    %c0_26 = arith.constant 0 : index
    %c0_27 = arith.constant 0 : index
    %46 = vector.load %arg8[%c0_26, %c0_27] : memref<32x32xf32, #tpu.memory_space<vmem>>, vector<32x32xf32>
    %c0_28 = arith.constant 0 : index
    %c0_29 = arith.constant 0 : index
    %47 = vector.load %arg9[%c0_28, %c0_29] : memref<1x32xf32, #tpu.memory_space<vmem>>, vector<1x32xf32>
    %cst_30 = arith.constant dense<0.000000e+00> : vector<32x32xf32>
    %48 = tpu.matmul %1, %44, %cst_30 {dimension_numbers = #tpu.dot_dimension_numbers<[1], [0], [0], [1], [0, 0, 1, 1], [], []>} : vector<32x32xf32>, vector<32x32xf32>, vector<32x32xf32> -> vector<32x32xf32>
    %49 = vector.broadcast %5 : vector<32x1xf32> to vector<32x32xf32>
    %50 = arith.divf %48, %49 : vector<32x32xf32>
    %cst_31 = arith.constant dense<0.000000e+00> : vector<32x32xf32>
    %51 = tpu.matmul %50, %45, %cst_31 {dimension_numbers = #tpu.dot_dimension_numbers<[1], [0], [0], [1], [0, 0, 1, 1], [], []>} : vector<32x32xf32>, vector<32x32xf32>, vector<32x32xf32> -> vector<32x32xf32>
    %cst_32 = arith.constant dense<0.000000e+00> : vector<32x32xf32>
    %52 = tpu.matmul %44, %46, %cst_32 {dimension_numbers = #tpu.dot_dimension_numbers<[1], [0], [0], [1], [0, 0, 1, 1], [], []>} : vector<32x32xf32>, vector<32x32xf32>, vector<32x32xf32> -> vector<32x32xf32>
    %53 = arith.addf %51, %52 : vector<32x32xf32>
    %54 = vector.broadcast %47 : vector<1x32xf32> to vector<32x32xf32>
    %55 = arith.addf %53, %54 : vector<32x32xf32>
    %cst_33 = arith.constant 0.000000e+00 : f32
    %56 = vector.broadcast %cst_33 : f32 to vector<32x32xf32>
    %57 = arith.maximumf %55, %56 : vector<32x32xf32>
    %c0_34 = arith.constant 0 : index
    %c0_35 = arith.constant 0 : index
    %58 = vector.load %arg10[%c0_34, %c0_35] : memref<1x32xf32, #tpu.memory_space<vmem>>, vector<1x32xf32>
    %c0_36 = arith.constant 0 : index
    %c0_37 = arith.constant 0 : index
    %59 = vector.load %arg11[%c0_36, %c0_37] : memref<1x32xf32, #tpu.memory_space<vmem>>, vector<1x32xf32>
    %cst_38 = arith.constant dense<0.000000e+00> : vector<32xf32>
    %60 = vector.multi_reduction <add>, %57, %cst_38 [0] : vector<32x32xf32> to vector<32xf32>
    %61 = vector.shape_cast %60 : vector<32xf32> to vector<1x32xf32>
    %cst_39 = arith.constant 3.200000e+01 : f32
    %62 = vector.broadcast %cst_39 : f32 to vector<1x32xf32>
    %63 = arith.divf %61, %62 : vector<1x32xf32>
    %64 = arith.mulf %57, %57 : vector<32x32xf32>
    %cst_40 = arith.constant dense<0.000000e+00> : vector<32xf32>
    %65 = vector.multi_reduction <add>, %64, %cst_40 [0] : vector<32x32xf32> to vector<32xf32>
    %66 = vector.shape_cast %65 : vector<32xf32> to vector<1x32xf32>
    %cst_41 = arith.constant 3.200000e+01 : f32
    %67 = vector.broadcast %cst_41 : f32 to vector<1x32xf32>
    %68 = arith.divf %66, %67 : vector<1x32xf32>
    %69 = arith.mulf %63, %63 : vector<1x32xf32>
    %70 = arith.subf %68, %69 : vector<1x32xf32>
    %cst_42 = arith.constant 0.000000e+00 : f32
    %71 = vector.broadcast %cst_42 : f32 to vector<1x32xf32>
    %72 = arith.maximumf %70, %71 : vector<1x32xf32>
    %73 = vector.broadcast %63 : vector<1x32xf32> to vector<32x32xf32>
    %74 = arith.subf %57, %73 : vector<32x32xf32>
    %cst_43 = arith.constant 9.99999974E-6 : f32
    %75 = vector.broadcast %cst_43 : f32 to vector<1x32xf32>
    %76 = arith.addf %72, %75 : vector<1x32xf32>
    %77 = math.rsqrt %76 : vector<1x32xf32>
    %78 = vector.broadcast %77 : vector<1x32xf32> to vector<32x32xf32>
    %79 = arith.mulf %74, %78 : vector<32x32xf32>
    %80 = vector.broadcast %58 : vector<1x32xf32> to vector<32x32xf32>
    %81 = arith.mulf %79, %80 : vector<32x32xf32>
    %82 = vector.broadcast %59 : vector<1x32xf32> to vector<32x32xf32>
    %83 = arith.addf %81, %82 : vector<32x32xf32>
    %c0_44 = arith.constant 0 : index
    %c0_45 = arith.constant 0 : index
    %84 = vector.load %arg12[%c0_44, %c0_45] : memref<32x32xf32, #tpu.memory_space<vmem>>, vector<32x32xf32>
    %c0_46 = arith.constant 0 : index
    %c0_47 = arith.constant 0 : index
    %85 = vector.load %arg13[%c0_46, %c0_47] : memref<32x32xf32, #tpu.memory_space<vmem>>, vector<32x32xf32>
    %c0_48 = arith.constant 0 : index
    %c0_49 = arith.constant 0 : index
    %86 = vector.load %arg14[%c0_48, %c0_49] : memref<1x32xf32, #tpu.memory_space<vmem>>, vector<1x32xf32>
    %cst_50 = arith.constant dense<0.000000e+00> : vector<32x32xf32>
    %87 = tpu.matmul %1, %83, %cst_50 {dimension_numbers = #tpu.dot_dimension_numbers<[1], [0], [0], [1], [0, 0, 1, 1], [], []>} : vector<32x32xf32>, vector<32x32xf32>, vector<32x32xf32> -> vector<32x32xf32>
    %88 = vector.broadcast %5 : vector<32x1xf32> to vector<32x32xf32>
    %89 = arith.divf %87, %88 : vector<32x32xf32>
    %cst_51 = arith.constant dense<0.000000e+00> : vector<32x32xf32>
    %90 = tpu.matmul %89, %84, %cst_51 {dimension_numbers = #tpu.dot_dimension_numbers<[1], [0], [0], [1], [0, 0, 1, 1], [], []>} : vector<32x32xf32>, vector<32x32xf32>, vector<32x32xf32> -> vector<32x32xf32>
    %cst_52 = arith.constant dense<0.000000e+00> : vector<32x32xf32>
    %91 = tpu.matmul %83, %85, %cst_52 {dimension_numbers = #tpu.dot_dimension_numbers<[1], [0], [0], [1], [0, 0, 1, 1], [], []>} : vector<32x32xf32>, vector<32x32xf32>, vector<32x32xf32> -> vector<32x32xf32>
    %92 = arith.addf %90, %91 : vector<32x32xf32>
    %93 = vector.broadcast %86 : vector<1x32xf32> to vector<32x32xf32>
    %94 = arith.addf %92, %93 : vector<32x32xf32>
    %cst_53 = arith.constant 0.000000e+00 : f32
    %95 = vector.broadcast %cst_53 : f32 to vector<32x32xf32>
    %96 = arith.maximumf %94, %95 : vector<32x32xf32>
    %c0_54 = arith.constant 0 : index
    %c0_55 = arith.constant 0 : index
    %97 = vector.load %arg15[%c0_54, %c0_55] : memref<1x32xf32, #tpu.memory_space<vmem>>, vector<1x32xf32>
    %c0_56 = arith.constant 0 : index
    %c0_57 = arith.constant 0 : index
    %98 = vector.load %arg16[%c0_56, %c0_57] : memref<1x32xf32, #tpu.memory_space<vmem>>, vector<1x32xf32>
    %cst_58 = arith.constant dense<0.000000e+00> : vector<32xf32>
    %99 = vector.multi_reduction <add>, %96, %cst_58 [0] : vector<32x32xf32> to vector<32xf32>
    %100 = vector.shape_cast %99 : vector<32xf32> to vector<1x32xf32>
    %cst_59 = arith.constant 3.200000e+01 : f32
    %101 = vector.broadcast %cst_59 : f32 to vector<1x32xf32>
    %102 = arith.divf %100, %101 : vector<1x32xf32>
    %103 = arith.mulf %96, %96 : vector<32x32xf32>
    %cst_60 = arith.constant dense<0.000000e+00> : vector<32xf32>
    %104 = vector.multi_reduction <add>, %103, %cst_60 [0] : vector<32x32xf32> to vector<32xf32>
    %105 = vector.shape_cast %104 : vector<32xf32> to vector<1x32xf32>
    %cst_61 = arith.constant 3.200000e+01 : f32
    %106 = vector.broadcast %cst_61 : f32 to vector<1x32xf32>
    %107 = arith.divf %105, %106 : vector<1x32xf32>
    %108 = arith.mulf %102, %102 : vector<1x32xf32>
    %109 = arith.subf %107, %108 : vector<1x32xf32>
    %cst_62 = arith.constant 0.000000e+00 : f32
    %110 = vector.broadcast %cst_62 : f32 to vector<1x32xf32>
    %111 = arith.maximumf %109, %110 : vector<1x32xf32>
    %112 = vector.broadcast %102 : vector<1x32xf32> to vector<32x32xf32>
    %113 = arith.subf %96, %112 : vector<32x32xf32>
    %cst_63 = arith.constant 9.99999974E-6 : f32
    %114 = vector.broadcast %cst_63 : f32 to vector<1x32xf32>
    %115 = arith.addf %111, %114 : vector<1x32xf32>
    %116 = math.rsqrt %115 : vector<1x32xf32>
    %117 = vector.broadcast %116 : vector<1x32xf32> to vector<32x32xf32>
    %118 = arith.mulf %113, %117 : vector<32x32xf32>
    %119 = vector.broadcast %97 : vector<1x32xf32> to vector<32x32xf32>
    %120 = arith.mulf %118, %119 : vector<32x32xf32>
    %121 = vector.broadcast %98 : vector<1x32xf32> to vector<32x32xf32>
    %122 = arith.addf %120, %121 : vector<32x32xf32>
    %c0_64 = arith.constant 0 : index
    %c0_65 = arith.constant 0 : index
    %123 = vector.load %arg17[%c0_64, %c0_65] : memref<32x32xf32, #tpu.memory_space<vmem>>, vector<32x32xf32>
    %cst_66 = arith.constant dense<0.000000e+00> : vector<32x32xf32>
    %124 = tpu.matmul %44, %123, %cst_66 {dimension_numbers = #tpu.dot_dimension_numbers<[1], [0], [0], [1], [0, 0, 1, 1], [], []>} : vector<32x32xf32>, vector<32x32xf32>, vector<32x32xf32> -> vector<32x32xf32>
    %c0_67 = arith.constant 0 : index
    %c0_68 = arith.constant 0 : index
    %125 = vector.load %arg18[%c0_67, %c0_68] : memref<32x32xf32, #tpu.memory_space<vmem>>, vector<32x32xf32>
    %cst_69 = arith.constant dense<0.000000e+00> : vector<32x32xf32>
    %126 = tpu.matmul %83, %125, %cst_69 {dimension_numbers = #tpu.dot_dimension_numbers<[1], [0], [0], [1], [0, 0, 1, 1], [], []>} : vector<32x32xf32>, vector<32x32xf32>, vector<32x32xf32> -> vector<32x32xf32>
    %127 = arith.addf %124, %126 : vector<32x32xf32>
    %c0_70 = arith.constant 0 : index
    %c0_71 = arith.constant 0 : index
    %128 = vector.load %arg19[%c0_70, %c0_71] : memref<32x32xf32, #tpu.memory_space<vmem>>, vector<32x32xf32>
    %cst_72 = arith.constant dense<0.000000e+00> : vector<32x32xf32>
    %129 = tpu.matmul %122, %128, %cst_72 {dimension_numbers = #tpu.dot_dimension_numbers<[1], [0], [0], [1], [0, 0, 1, 1], [], []>} : vector<32x32xf32>, vector<32x32xf32>, vector<32x32xf32> -> vector<32x32xf32>
    %130 = arith.addf %127, %129 : vector<32x32xf32>
    %c0_73 = arith.constant 0 : index
    %c0_74 = arith.constant 0 : index
    %131 = vector.load %arg20[%c0_73, %c0_74] : memref<1x32xf32, #tpu.memory_space<vmem>>, vector<1x32xf32>
    %132 = vector.broadcast %131 : vector<1x32xf32> to vector<32x32xf32>
    %133 = arith.addf %130, %132 : vector<32x32xf32>
    %cst_75 = arith.constant 0.000000e+00 : f32
    %134 = vector.broadcast %cst_75 : f32 to vector<32x32xf32>
    %135 = arith.maximumf %133, %134 : vector<32x32xf32>
    %c0_76 = arith.constant 0 : index
    %c0_77 = arith.constant 0 : index
    %136 = vector.load %arg21[%c0_76, %c0_77] : memref<32x32xf32, #tpu.memory_space<vmem>>, vector<32x32xf32>
    tpu.vector_store %arg21[%c0_76, %c0_77], %135 {strides = array<i32>} : memref<32x32xf32, #tpu.memory_space<vmem>>, vector<32x32xf32>,
    return
  }
}

</mosaic_0001>

<bundles_post_ra>
// kernel: tpu_custom_call.1
= control target key start
LH: loop header
LB: loop body
LE: loop exit
PB: predicated region body
PF: predicated region fallthrough
CT: control target
= control target key end

     0   :  { %s2779_s0 = inlined_call_operand.vmem [shape: f32[32,8], index: 0, kind: input, shape index: {}]   ;;  %s2780_s1 = inlined_call_operand.vmem [shape: f32[32,32], index: 1, kind: input, shape index: {}]   ;;  %s2781_s2 = inlined_call_operand.hbm [shape: f32[8,32], index: 2, kind: input, shape index: {}]   ;;  %s2782_s3 = inlined_call_operand.hbm [shape: f32[8,32], index: 3, kind: input, shape index: {}]   ;;  %s2783_s4 = inlined_call_operand.vmem [shape: f32[1,32], index: 4, kind: input, shape index: {}]   ;;  %s2784_s5 = inlined_call_operand.hbm [shape: f32[1,32], index: 5, kind: input, shape index: {}]   ;;  %s2785_s6 = inlined_call_operand.hbm [shape: f32[1,32], index: 6, kind: input, shape index: {}]   ;;  %s2786_s7 = inlined_call_operand.hbm [shape: f32[32,32], index: 7, kind: input, shape index: {}]   ;;  %s2787_s8 = inlined_call_operand.hbm [shape: f32[32,32], index: 8, kind: input, shape index: {}]   ;;  %s2788_s9 = inlined_call_operand.hbm [shape: f32[1,32], index: 9, kind: input, shape index: {}]   ;;  %s2789_s10 = inlined_call_operand.hbm [shape: f32[1,32], index: 10, kind: input, shape index: {}]   ;;  %s2790_s11 = inlined_call_operand.hbm [shape: f32[1,32], index: 11, kind: input, shape index: {}]   ;;  %s2791_s12 = inlined_call_operand.hbm [shape: f32[32,32], index: 12, kind: input, shape index: {}]   ;;  %s2792_s13 = inlined_call_operand.hbm [shape: f32[32,32], index: 13, kind: input, shape index: {}]   ;;  %s2793_s14 = inlined_call_operand.hbm [shape: f32[1,32], index: 14, kind: input, shape index: {}]   ;;  %s2794_s15 = inlined_call_operand.vmem [shape: f32[1,32], index: 15, kind: input, shape index: {}]   ;;  %s2795_s16 = inlined_call_operand.vmem [shape: f32[1,32], index: 16, kind: input, shape index: {}]   ;;  %s2796_s17 = inlined_call_operand.vmem [shape: f32[32,32], index: 17, kind: input, shape index: {}]   ;;  %s2797_s18 = inlined_call_operand.hbm [shape: f32[32,32], index: 18, kind: input, shape index: {}]   ;;  %s2798_s19 = inlined_call_operand.hbm [shape: f32[32,32], index: 19, kind: input, shape index: {}]   ;;  %s2799_s20 = inlined_call_operand.vmem [shape: f32[1,32], index: 20, kind: input, shape index: {}]   ;;  %s2800_s21 = inlined_call_operand.hbm [shape: f32[32,32], index: 21, kind: output, shape index: {}]  }
   0x1   :  { %2803 = sst [smem:[#allocation35_spill]] %s2779_s0 }
   0x2   :  { %2804 = sst [smem:[#allocation36_spill]] %s2780_s1 }
   0x3   :  { %2805 = sst [smem:[#allocation37_spill]] %s2781_s2 }
   0x4   :  { %2806 = sst [smem:[#allocation38_spill]] %s2782_s3 }
   0x5   :  { %2807 = sst [smem:[#allocation39_spill]] %s2783_s4 }
   0x6   :  { %2808 = sst [smem:[#allocation40_spill]] %s2784_s5 }
   0x7   :  { %26 = vsyncpa [#allocation3], 0 }
   0x8   :  { %27 = vsyncpa [#allocation6], 0 }
   0x9   :  { %28 = vsyncpa [#allocation9], 0 }
   0xa   :  { %29 = vsyncpa [#allocation12], 0 }
   0xb   :  { %30 = vsyncpa [#allocation15], 0 }
   0xc   :  { %31 = vsyncpa [#allocation18], 0 }
   0xd   :  { %32 = vsyncpa [#allocation21], 0 }
   0xe   :  { %33 = vsyncpa [#allocation24], 0 }
   0xf   :  { %34 = vsyncpa [#allocation4], 0  ;;  %s2386_s2 = smov [#allocation5]   ;;  %s2387_s26 = smov [#allocation8]  }
  0x10   :  { %s55_s25 = sshll.u32 %s2386_s2, 4  ;;  %s77_s27 = sshll.u32 %s2387_s26, 4  ;;  %s56_s25 = int_to_ptr.vmem [resolvable:$true] %s55_s25  ;;  %s78_s27 = int_to_ptr.vmem [resolvable:$true] %s77_s27 }
  0x11   :  { %s2076_s3 = scalar_lea.vmem %s56_s25, 128  ;;  %p2081_p1 = scmp.lt.s32.totalorder %s56_s25, %s56_s25 }
  0x12   :  { %p2077_p0 = scmp.ne.s32.totalorder %s56_s25, %s2076_s3  ;;  %p2082_p2 = scmp.lt.s32.totalorder %s2076_s3, %s2076_s3 }
  0x14   :  { %p2083_p3 = por %p2082_p2, %p2081_p1 }
  0x16   :  { %p2084_p4 = pnand %p2083_p3, %p2077_p0 }
  0x18   :  { %2087 = shalt.err (!%p2084_p4)
}
  0x19   :  { %s2809_s0 = sld [smem:[#allocation38_spill]]  ;;  %s2096_s4 = scalar_lea.vmem %s78_s27, 16 }
  0x1a   :  { %p2097_p5 = scmp.ne.s32.totalorder %s78_s27, %s2096_s4  ;;  %s2100_s30 = scalar_lea.vmem %s78_s27, 32 }
  0x1b   :  { %p2101_p6 = scmp.lt.s32.totalorder %s78_s27, %s78_s27  ;;  %p2102_p7 = scmp.lt.s32.totalorder %s2100_s30, %s2096_s4 }
  0x1d   :  { %p2103_p8 = por %p2102_p7, %p2101_p6 }
  0x1f   :  { %58 = dma.hbm_to_vmem [thread:$0]  %s2809_s0, 128, %s56_s25, [#allocation6]  }
  0x20   :  { %p2104_p9 = pnand %p2103_p8, %p2097_p5 }
  0x22   :  { %2107 = shalt.err (!%p2104_p9)
}
  0x23   :  { %80 = dma.hbm_to_vmem [thread:$0]  %s2785_s6, 16, %s78_s27, [#allocation9]  }
  0x24   :  { %s2388_s23 = smov [#allocation11]   ;;  %s2389_s24 = smov [#allocation14]  }
  0x25   :  { %s98_s1 = sshll.u32 %s2388_s23, 4  ;;  %s121_s2 = sshll.u32 %s2389_s24, 4  ;;  %s99_s1 = int_to_ptr.vmem [resolvable:$true] %s98_s1  ;;  %s122_s2 = int_to_ptr.vmem [resolvable:$true] %s121_s2 }
  0x26   :  { %s2116_s26 = scalar_lea.vmem %s99_s1, 512  ;;  %p2121_p11 = scmp.lt.s32.totalorder %s99_s1, %s99_s1 }
  0x27   :  { %p2117_p10 = scmp.ne.s32.totalorder %s99_s1, %s2116_s26  ;;  %p2122_p12 = scmp.lt.s32.totalorder %s2116_s26, %s2116_s26 }
  0x29   :  { %p2123_p13 = por %p2122_p12, %p2121_p11 }
  0x2b   :  { %p2124_p0 = pnand %p2123_p13, %p2117_p10 }
  0x2d   :  { %2127 = shalt.err (!%p2124_p0)
}
  0x2e   :  { %s2390_s25 = smov 128   ;;  %s2391_s3 = smov 8  }
  0x2f   :  { %104 = dma.hbm_to_vmem [thread:$0]  %s2787_s8, 512, %s99_s1, [#allocation12], %s2390_s25, %s2390_s25, %s2391_s3  }
  0x30   :  { %s2136_s27 = scalar_lea.vmem %s122_s2, 16  ;;  %s2140_s29 = scalar_lea.vmem %s122_s2, 32 }
  0x31   :  { %p2137_p1 = scmp.ne.s32.totalorder %s122_s2, %s2136_s27  ;;  %p2141_p2 = scmp.lt.s32.totalorder %s122_s2, %s122_s2 }
  0x32   :  { %p2142_p3 = scmp.lt.s32.totalorder %s2140_s29, %s2136_s27 }
  0x34   :  { %p2143_p4 = por %p2142_p3, %p2141_p2 }
  0x36   :  { %p2144_p5 = pnand %p2143_p4, %p2137_p1 }
  0x38   :  { %2147 = shalt.err (!%p2144_p5)
}
  0x39   :  { %124 = dma.hbm_to_vmem [thread:$0]  %s2789_s10, 16, %s122_s2, [#allocation15]  }
  0x3a   :  { %s2392_s30 = smov [#allocation17]   ;;  %s2393_s22 = smov [#allocation20]  }
  0x3b   :  { %s140_s5 = sshll.u32 %s2392_s30, 4  ;;  %s165_s23 = sshll.u32 %s2393_s22, 4  ;;  %s141_s5 = int_to_ptr.vmem [resolvable:$true] %s140_s5  ;;  %s166_s23 = int_to_ptr.vmem [resolvable:$true] %s165_s23 }
  0x3c   :  { %s2156_s24 = scalar_lea.vmem %s141_s5, 512  ;;  %p2161_p7 = scmp.lt.s32.totalorder %s141_s5, %s141_s5 }
  0x3d   :  { %p2157_p6 = scmp.ne.s32.totalorder %s141_s5, %s2156_s24  ;;  %p2162_p8 = scmp.lt.s32.totalorder %s2156_s24, %s2156_s24 }
  0x3f   :  { %p2163_p9 = por %p2162_p8, %p2161_p7 }
  0x41   :  { %p2164_p10 = pnand %p2163_p9, %p2157_p6 }
  0x43   :  { %2167 = shalt.err (!%p2164_p10)
}
  0x44   :  { %146 = dma.hbm_to_vmem [thread:$0]  %s2791_s12, 512, %s141_s5, [#allocation18], %s2390_s25, %s2390_s25, %s2391_s3  }
  0x45   :  { %s2176_s10 = scalar_lea.vmem %s166_s23, 16  ;;  %s2180_s2 = scalar_lea.vmem %s166_s23, 32 }
  0x46   :  { %p2177_p11 = scmp.ne.s32.totalorder %s166_s23, %s2176_s10  ;;  %p2181_p12 = scmp.lt.s32.totalorder %s166_s23, %s166_s23 }
  0x47   :  { %p2182_p13 = scmp.lt.s32.totalorder %s2180_s2, %s2176_s10 }
  0x49   :  { %p2183_p0 = por %p2182_p13, %p2181_p12 }
  0x4b   :  { %p2184_p1 = pnand %p2183_p0, %p2177_p11 }
  0x4d   :  { %2187 = shalt.err (!%p2184_p1)
}
  0x4e   :  { %168 = dma.hbm_to_vmem [thread:$0]  %s2793_s14, 16, %s166_s23, [#allocation21]  }
  0x4f   :  { %s2394_s6 = smov [#allocation2]   ;;  %s2395_s29 = smov [#allocation7]  }
  0x50   :  { %s45_s27 = sshll.u32 %s2394_s6, 4  ;;  %s67_s0 = sshll.u32 %s2395_s29, 4  ;;  %s46_s27 = int_to_ptr.vmem [resolvable:$true] %s45_s27  ;;  %s68_s0 = int_to_ptr.vmem [resolvable:$true] %s67_s0 }
  0x51   :  { %s2196_s4 = scalar_lea.vmem %s46_s27, 128  ;;  %p2201_p3 = scmp.lt.s32.totalorder %s46_s27, %s46_s27 }
  0x52   :  { %p2197_p2 = scmp.ne.s32.totalorder %s46_s27, %s2196_s4  ;;  %p2202_p4 = scmp.lt.s32.totalorder %s2196_s4, %s2196_s4 }
  0x54   :  { %p2203_p5 = por %p2202_p4, %p2201_p3 }
  0x56   :  { %p2204_p6 = pnand %p2203_p5, %p2197_p2 }
  0x58   :  { %2207 = shalt.err (!%p2204_p6)
}
  0x59   :  { %s2810_s5 = sld [smem:[#allocation37_spill]]  ;;  %s2216_s22 = scalar_lea.vmem %s68_s0, 16 }
  0x5a   :  { %p2217_p7 = scmp.ne.s32.totalorder %s68_s0, %s2216_s22  ;;  %s2220_s14 = scalar_lea.vmem %s68_s0, 32 }
  0x5b   :  { %p2221_p8 = scmp.lt.s32.totalorder %s68_s0, %s68_s0  ;;  %p2222_p9 = scmp.lt.s32.totalorder %s2220_s14, %s2216_s22 }
  0x5d   :  { %p2223_p10 = por %p2222_p9, %p2221_p8 }
  0x5f   :  { %48 = dma.hbm_to_vmem [thread:$0]  %s2810_s5, 128, %s46_s27, [#allocation3]  }
  0x60   :  { %p2224_p11 = pnand %p2223_p10, %p2217_p7 }
  0x62   :  { %2227 = shalt.err (!%p2224_p11)
}
  0x63   :  { %s2811_s8 = sld [smem:[#allocation40_spill]]  ;;  %s2396_s1 = smov [#allocation10]  }
  0x64   :  { %s86_s10 = sshll.u32 %s2396_s1, 4  ;;  %s2397_s2 = smov [#allocation13]   ;;  %s87_s10 = int_to_ptr.vmem [resolvable:$true] %s86_s10 }
  0x65   :  { %s111_s26 = sshll.u32 %s2397_s2, 4  ;;  %s2236_s28 = scalar_lea.vmem %s87_s10, 512  ;;  %s112_s26 = int_to_ptr.vmem [resolvable:$true] %s111_s26 }
  0x66   :  { %p2237_p12 = scmp.ne.s32.totalorder %s87_s10, %s2236_s28  ;;  %p2241_p13 = scmp.lt.s32.totalorder %s87_s10, %s87_s10 }
  0x67   :  { %p2242_p0 = scmp.lt.s32.totalorder %s2236_s28, %s2236_s28 }
  0x69   :  { %70 = dma.hbm_to_vmem [thread:$0]  %s2811_s8, 16, %s68_s0, [#allocation6]  }
  0x6a   :  { %p2243_p1 = por %p2242_p0, %p2241_p13 }
  0x6c   :  { %p2244_p2 = pnand %p2243_p1, %p2237_p12 }
  0x6e   :  { %2247 = shalt.err (!%p2244_p2)
}
  0x6f   :  { %92 = dma.hbm_to_vmem [thread:$0]  %s2786_s7, 512, %s87_s10, [#allocation9], %s2390_s25, %s2390_s25, %s2391_s3  }
  0x70   :  { %s2256_s29 = scalar_lea.vmem %s112_s26, 16  ;;  %s2260_s0 = scalar_lea.vmem %s112_s26, 32 }
  0x71   :  { %p2257_p3 = scmp.ne.s32.totalorder %s112_s26, %s2256_s29  ;;  %p2261_p4 = scmp.lt.s32.totalorder %s112_s26, %s112_s26 }
  0x72   :  { %p2262_p5 = scmp.lt.s32.totalorder %s2260_s0, %s2256_s29 }
  0x74   :  { %p2263_p6 = por %p2262_p5, %p2261_p4 }
  0x76   :  { %p2264_p7 = pnand %p2263_p6, %p2257_p3 }
  0x78   :  { %2267 = shalt.err (!%p2264_p7)
}
  0x79   :  { %114 = dma.hbm_to_vmem [thread:$0]  %s2788_s9, 16, %s112_s26, [#allocation12]  }
  0x7a   :  { %s2398_s30 = smov [#allocation16]   ;;  %s2399_s22 = smov [#allocation19]  }
  0x7b   :  { %s131_s5 = sshll.u32 %s2398_s30, 4  ;;  %s152_s14 = sshll.u32 %s2399_s22, 4  ;;  %s132_s5 = int_to_ptr.vmem [resolvable:$true] %s131_s5  ;;  %s153_s14 = int_to_ptr.vmem [resolvable:$true] %s152_s14 }
  0x7c   :  { %s2276_s23 = scalar_lea.vmem %s132_s5, 16  ;;  %s2280_s7 = scalar_lea.vmem %s132_s5, 32 }
  0x7d   :  { %p2277_p8 = scmp.ne.s32.totalorder %s132_s5, %s2276_s23  ;;  %p2281_p9 = scmp.lt.s32.totalorder %s132_s5, %s132_s5 }
  0x7e   :  { %p2282_p10 = scmp.lt.s32.totalorder %s2280_s7, %s2276_s23 }
  0x80   :  { %p2283_p11 = por %p2282_p10, %p2281_p9 }
  0x82   :  { %p2284_p12 = pnand %p2283_p11, %p2277_p8 }
  0x84   :  { %2287 = shalt.err (!%p2284_p12)
}
  0x85   :  { %134 = dma.hbm_to_vmem [thread:$0]  %s2790_s11, 16, %s132_s5, [#allocation15]  }
  0x86   :  { %s2296_s1 = scalar_lea.vmem %s153_s14, 512  ;;  %p2301_p0 = scmp.lt.s32.totalorder %s153_s14, %s153_s14 }
  0x87   :  { %p2297_p13 = scmp.ne.s32.totalorder %s153_s14, %s2296_s1  ;;  %p2302_p1 = scmp.lt.s32.totalorder %s2296_s1, %s2296_s1 }
  0x89   :  { %p2303_p2 = por %p2302_p1, %p2301_p0 }
  0x8b   :  { %p2304_p3 = pnand %p2303_p2, %p2297_p13 }
  0x8d   :  { %2307 = shalt.err (!%p2304_p3)
}
  0x8e   :  { %158 = dma.hbm_to_vmem [thread:$0]  %s2792_s13, 512, %s153_s14, [#allocation18], %s2390_s25, %s2390_s25, %s2391_s3  }
  0x8f   :  { %s2400_s2 = smov [#allocation22]   ;;  %s2401_s28 = smov [#allocation23]  }
  0x90   :  { %s180_s26 = sshll.u32 %s2400_s2, 4  ;;  %s192_s6 = sshll.u32 %s2401_s28, 4  ;;  %s181_s26 = int_to_ptr.vmem [resolvable:$true] %s180_s26  ;;  %s193_s6 = int_to_ptr.vmem [resolvable:$true] %s192_s6 }
  0x91   :  { %s2316_s11 = scalar_lea.vmem %s181_s26, 512  ;;  %p2321_p5 = scmp.lt.s32.totalorder %s181_s26, %s181_s26 }
  0x92   :  { %p2317_p4 = scmp.ne.s32.totalorder %s181_s26, %s2316_s11  ;;  %p2322_p6 = scmp.lt.s32.totalorder %s2316_s11, %s2316_s11 }
  0x94   :  { %p2323_p7 = por %p2322_p6, %p2321_p5 }
  0x96   :  { %p2324_p8 = pnand %p2323_p7, %p2317_p4 }
  0x98   :  { %2327 = shalt.err (!%p2324_p8)
}
  0x99   :  { %186 = dma.hbm_to_vmem [thread:$0]  %s2797_s18, 512, %s181_s26, [#allocation21], %s2390_s25, %s2390_s25, %s2391_s3  }
  0x9a   :  { %s2336_s13 = scalar_lea.vmem %s193_s6, 512  ;;  %p2341_p10 = scmp.lt.s32.totalorder %s193_s6, %s193_s6 }
  0x9b   :  { %p2337_p9 = scmp.ne.s32.totalorder %s193_s6, %s2336_s13  ;;  %p2342_p11 = scmp.lt.s32.totalorder %s2336_s13, %s2336_s13 }
  0x9d   :  { %p2343_p12 = por %p2342_p11, %p2341_p10 }
  0x9f   :  { %p2344_p13 = pnand %p2343_p12, %p2337_p9 }
  0xa1   :  { %2347 = shalt.err (!%p2344_p13)
}
  0xa2   :  { %198 = dma.hbm_to_vmem [thread:$0]  %s2798_s19, 512, %s193_s6, [#allocation24], %s2390_s25, %s2390_s25, %s2391_s3  }
  0xa3   :  { %2368 = dma.done.wait [#allocation3], 128  }
  0xa4   :  { %2369 = vsyncadd [#allocation3], 4294967168 }
  0xa5   :  { %2370 = dma.done.wait [#allocation6], 144  }
  0xa6   :  { %2371 = vsyncadd [#allocation6], 4294967152 }
  0xa7   :  { %2372 = dma.done.wait [#allocation9], 528  }
  0xa8   :  { %2373 = vsyncadd [#allocation9], 4294966768 }
  0xa9   :  { %2374 = dma.done.wait [#allocation12], 528  }
  0xaa   :  { %2375 = vsyncadd [#allocation12], 4294966768 }
  0xab   :  { %2376 = dma.done.wait [#allocation15], 32  }
  0xac   :  { %2377 = vsyncadd [#allocation15], 4294967264 }
  0xad   :  { %2378 = dma.done.wait [#allocation18], 1024  }
  0xae   :  { %2379 = vsyncadd [#allocation18], 4294966272 }
  0xaf   :  { %2380 = dma.done.wait [#allocation21], 528  }
  0xb0   :  { %2381 = vsyncadd [#allocation21], 4294966768 }
  0xb1   :  { %2382 = dma.done.wait [#allocation24], 512  }
  0xb2   :  { %2383 = vsyncadd [#allocation24], 4294966784  ;;  %vm251_vm0 = vcmask 261120   ;;  %s2812_s19 = sld [smem:[#allocation35_spill]]  ;;  %v269_v12 = vld [vmem:[#allocation5] sm:$0xff]  ;;  %vm376_vm1 = vcmask 64512  }
  0xb3   :  { %s2813_s23 = sld [smem:[#allocation36_spill]]  ;;  %v268_v13 = vld [vmem:[#allocation2] sm:$0xff]  ;;  %1887 = vmatprep.subr.mxu1 %v269_v12  ;;  %v660_v34 = vld [vmem:[#allocation11 + $0x18] sm:$0xff]  ;;  %v657_v37 = vld [vmem:[#allocation11] sm:$0xff]  ;;  %s2402_s7 = smov [#allocation25]  }
  0xb4   :  { %1888 = vmatpush3.msra.mxu1 %v269_v12  ;;  %v659_v35 = vld [vmem:[#allocation11 + $0x10] sm:$0xff]  ;;  %v658_v36 = vld [vmem:[#allocation11 + $0x8] sm:$0xff]  ;;  %s2814_s29 = sld [smem:[#allocation39_spill]]  ;;  %s1706_s24 = sshll.u32 %s2402_s7, 4  ;;  %s1707_s24 = int_to_ptr.vmem [resolvable:$true] %s1706_s24 }
  0xb5   :  { %1895 = vmatprep.subr.mxu1 %v268_v13  ;;  %p2353_p1 = scmp.lt.s32.totalorder %s1707_s24, %s1707_s24 }
  0xb8   :  { %v246_v0 = vld [vmem:[%s2812_s19 + $0x18] sm:$0xff]  ;;  %v245_v1 = vld [vmem:[%s2812_s19 + $0x10] sm:$0xff]  ;;  %v244_v3 = vld [vmem:[%s2812_s19 + $0x8] sm:$0xff] }
  0xb9   :  { %1873 = vmatprep.subr.mxu0 %v246_v0  ;;  %v2582_v2 = vld [vmem:[%s2813_s23] sm:$0xff]  ;;  %v2592_v4 = vld [vmem:[%s2813_s23 + $0x10] sm:$0xff]  ;;  %v2599_v6 = vld [vmem:[%s2813_s23 + $0x8] sm:$0xff] }
  0xba   :  { %1874 = vmatpush3.msra.mxu0 %v246_v0  ;;  %1881 = vmatprep.mubr.msk.f32.mxu0 %vm251_vm0, %v2582_v2  ;;  %v252_v5 = vsel %vm251_vm0, %v2582_v2, 0.0  ;;  %v258_v7 = vsel %vm251_vm0, %v2592_v4, 0.0  ;;  %v243_v8 = vld [vmem:[%s2812_s19] sm:$0xff]  ;;  %v2609_v9 = vld [vmem:[%s2813_s23 + $0x18] sm:$0xff]  ;;  %v255_v10 = vsel %vm251_vm0, %v2599_v6, 0.0 }
  0xbb   :  { %1875 = vmatprep.subr.mxu0 %v245_v1  ;;  %253 = vadd.xlane.f32.xlu0 %v252_v5  ;;  %v261_v11 = vsel %vm251_vm0, %v2609_v9, 0.0  ;;  %v1737_v42 = vld [vmem:[%s2814_s29] ss:$0 sm:$0xff] }
  0xbc   :  { %1876 = vmatpush3.msra.mxu0 %v245_v1  ;;  %259 = vadd.xlane.f32.xlu1 %v258_v7 }
  0xbd   :  { %1877 = vmatprep.subr.mxu0 %v244_v3  ;;  %1889 = vmatprep.mubr.msk.f32.mxu1 %vm376_vm1, %v243_v8 }
  0xbe   :  { %1878 = vmatpush3.msra.mxu0 %v244_v3  ;;  %1890 = vmatmul.mubr.msk.f32.vlgmr.msra.gmra.mxu1 %vm376_vm1, %v244_v3 }
  0xbf   :  { %1879 = vmatprep.subr.mxu0 %v243_v8  ;;  %256 = vadd.xlane.f32.xlu0 %v255_v10 }
  0xc0   :  { %1880 = vmatpush3.msra.mxu0 %v243_v8  ;;  %262 = vadd.xlane.f32.xlu1 %v261_v11 }
  0xc1   :  { %1882 = vmatmul.mubr.msk.f32.vlgmr.msra.gmra.mxu0 %vm251_vm0, %v2599_v6  ;;  %1892 = vmatprep.mubr.msk.f32.mxu1 %vm376_vm1, %v245_v1 }
  0xc2   :  { %1884 = vmatprep.mubr.msk.f32.mxu0 %vm251_vm0, %v2592_v4  ;;  %1896 = vmatpush3.msra.mxu1 %v268_v13 }
  0xc3   :  { %1893 = vmatmul.mubr.msk.f32.gmra.mxu1 %vm376_vm1, %v246_v0  ;;  %1917 = vmatprep.subr.mxu1 %v660_v34 }
  0xc5   :  { %1885 = vmatmul.mubr.msk.f32.gmra.mxu0 %vm251_vm0, %v2609_v9 }
  0xc6   :  { %1911 = vmatprep.mubr.msk.f32.mxu0 %vm251_vm0, %v2582_v2 }
 0x144   :  { %v254_v14 = vpop.xlane.xlu0 %253 }
 0x145   :  { %v260_v15 = vpop.xlane.xlu1 %259  ;;  %v264_v18 = vmax.f32 %v254_v14, 1.0 }
 0x146   :  { %v266_v21 = vmax.f32 %v260_v15, 1.0 }
 0x148   :  { %v257_v16 = vpop.xlane.xlu0 %256 }
 0x149   :  { %v265_v17 = vmax.f32 %v257_v16, 1.0  ;;  %v263_v19 = vpop.xlane.xlu1 %262 }
 0x14a   :  { %v267_v20 = vmax.f32 %v263_v19, 1.0 }
 0x14b   :  { %2054 = vrcp.f32 %v265_v17 }
 0x14c   :  { %2056 = vrcp.f32 %v264_v18 }
 0x14d   :  { %2058 = vrcp.f32 %v267_v20 }
 0x14e   :  { %2060 = vrcp.f32 %v266_v21 }
 0x158   :  { %v2627_v23 = vpop.eup %2054 }
 0x159   :  { %v2629_v24 = vpop.eup %2056 }
 0x15a   :  { %v2633_v29 = vpop.eup %2058 }
 0x15b   :  { %v2636_v30 = vpop.eup %2060 }
 0x17e   :  { %v1891_v38 = vpop.f32.mrf.mxu1 }
 0x180   :  { %v455_v39 = vpop.f32.mrf.mxu1 }
 0x181   :  { %v1883_v22 = vpop.f32.mrf.mxu0 }
 0x182   :  { %v371_v27 = vmul.f32 %v2627_v23, %v1883_v22 }
 0x183   :  { %v349_v25 = vpop.f32.mrf.mxu0  ;;  %v1894_v40 = vpop.f32.mrf.mxu1 }
 0x184   :  { %v369_v26 = vmul.f32 %v2629_v24, %v349_v25 }
 0x185   :  { %v1886_v28 = vpop.f32.mrf.mxu0  ;;  %v465_v41 = vpop.f32.mrf.mxu1 }
 0x186   :  { %1897 = vmatprep.mubr.msk.f32.mxu1 %vm376_vm1, %v369_v26  ;;  %v375_v33 = vmul.f32 %v2633_v29, %v1886_v28 }
 0x187   :  { %v359_v31 = vpop.f32.mrf.mxu0  ;;  %1898 = vmatmul.mubr.msk.f32.vlgmr.msra.gmra.mxu1 %vm376_vm1, %v371_v27 }
 0x188   :  { %v373_v32 = vmul.f32 %v2636_v30, %v359_v31  ;;  %1918 = vmatpush3.msra.mxu1 %v660_v34 }
 0x189   :  { %1919 = vmatprep.subr.mxu1 %v659_v35 }
 0x18a   :  { %1900 = vmatprep.mubr.msk.f32.mxu1 %vm376_vm1, %v373_v32  ;;  %1920 = vmatpush3.msra.mxu1 %v659_v35 }
 0x18b   :  { %1901 = vmatmul.mubr.msk.f32.gmra.mxu1 %vm376_vm1, %v375_v33  ;;  %1921 = vmatprep.subr.mxu1 %v658_v36 }
 0x18c   :  { %1922 = vmatpush3.msra.mxu1 %v658_v36 }
 0x18d   :  { %1923 = vmatprep.subr.mxu1 %v657_v37 }
 0x18e   :  { %1924 = vmatpush3.msra.mxu1 %v657_v37 }
 0x247   :  { %v1899_v43 = vpop.f32.mrf.mxu1 }
 0x248   :  { %v558_v44 = vadd.f32 %v1899_v43, %v1891_v38 }
 0x249   :  { %v552_v45 = vpop.f32.mrf.mxu1 }
 0x24a   :  { %v578_v46 = vadd.f32 %v1737_v42, %v558_v44  ;;  %v553_v47 = vadd.f32 %v552_v45, %v455_v39  ;;  %v1738_v44 = vld [vmem:[#allocation7] ss:$0 sm:$0xff] }
 0x24b   :  { %v1902_v48 = vpop.f32.mrf.mxu1 }
 0x24c   :  { %v577_v49 = vadd.f32 %v1737_v42, %v553_v47  ;;  %v568_v50 = vadd.f32 %v1902_v48, %v1894_v40  ;;  %v582_v51 = vmax.f32 %v578_v46, 0.0 }
 0x24d   :  { %v562_v52 = vpop.f32.mrf.mxu1 }
 0x24e   :  { %v581_v53 = vmax.f32 %v577_v49, 0.0  ;;  %v580_v54 = vadd.f32 %v1737_v42, %v568_v50  ;;  %v563_v55 = vadd.f32 %v562_v52, %v465_v41  ;;  %v603_v57 = vmul.f32 %v582_v51, %v582_v51  ;;  %v1739_v49 = vld [vmem:[#allocation8] ss:$0 sm:$0xff] }
 0x24f   :  { %v588_v61 = vsel %vm251_vm0, %v582_v51, 0.0 }
 0x250   :  { %v602_v56 = vmul.f32 %v581_v53, %v581_v53  ;;  %v587_v58 = vsel %vm251_vm0, %v581_v53, 0.0  ;;  %v584_v59 = vmax.f32 %v580_v54, 0.0  ;;  %v579_v60 = vadd.f32 %v1737_v42, %v563_v55 }
 0x251   :  { %v589_v0 = vadd.f32 %v588_v61, %v587_v58  ;;  %v607_v1 = vsel %vm251_vm0, %v603_v57, 0.0 }
 0x252   :  { %v606_v62 = vsel %vm251_vm0, %v602_v56, 0.0  ;;  %v583_v63 = vmax.f32 %v579_v60, 0.0  ;;  %v605_v3 = vmul.f32 %v584_v59, %v584_v59  ;;  %v592_v11 = vsel %vm251_vm0, %v584_v59, 0.0  ;;  %v654_v60 = vld [vmem:[#allocation10 + $0x8] sm:$0xff] }
 0x253   :  { %v608_v8 = vadd.f32 %v607_v1, %v606_v62 }
 0x254   :  { %v590_v5 = vsel %vm251_vm0, %v583_v63, 0.0  ;;  %v604_v7 = vmul.f32 %v583_v63, %v583_v63  ;;  %v611_v15 = vsel %vm251_vm0, %v605_v3, 0.0 }
 0x255   :  { %v591_v10 = vadd.f32 %v590_v5, %v589_v0 }
 0x256   :  { %v609_v12 = vsel %vm251_vm0, %v604_v7, 0.0 }
 0x257   :  { %v593_v13 = vadd.f32 %v592_v11, %v591_v10  ;;  %v610_v14 = vadd.f32 %v609_v12, %v608_v8  ;;  %v1033_v8 = vld [vmem:[#allocation19 + $0x18] sm:$0xff]  ;;  %v1032_v10 = vld [vmem:[#allocation19 + $0x10] sm:$0xff]  ;;  %v1031_v11 = vld [vmem:[#allocation19 + $0x8] sm:$0xff] }
 0x258   :  { %v1030_v12 = vld [vmem:[#allocation19] sm:$0xff] }
 0x259   :  { %v594_v16 = vrot.slane %v593_v13, 4  ;;  %v612_v17 = vadd.f32 %v611_v15, %v610_v14 }
 0x25b   :  { %v595_v18 = vadd.f32 %v594_v16, %v593_v13  ;;  %v613_v19 = vrot.slane %v612_v17, 4  ;;  %v2694_v13 = vld [vmem:[#allocation22 + $0x18] sm:$0xff] }
 0x25c   :  { %v1752_v16 = vld [vmem:[#allocation13] ss:$0 sm:$0xff] }
 0x25d   :  { %v596_v20 = vrot.slane %v595_v18, 2  ;;  %v614_v21 = vadd.f32 %v613_v19, %v612_v17 }
 0x25f   :  { %v597_v22 = vadd.f32 %v596_v20, %v595_v18  ;;  %v615_v25 = vrot.slane %v614_v21, 2 }
 0x261   :  { %v598_v26 = vrot.slane %v597_v22, 1  ;;  %v616_v27 = vadd.f32 %v615_v25, %v614_v21 }
 0x263   :  { %v599_v28 = vadd.f32 %v598_v26, %v597_v22  ;;  %v617_v31 = vrot.slane %v616_v27, 1 }
 0x265   :  { %v601_v32 = vmul.f32 0.03125, %v599_v28  ;;  %v618_v33 = vadd.f32 %v617_v31, %v616_v27 }
 0x267   :  { %v619_v34 = vmul.f32 0.03125, %v618_v33  ;;  %v620_v35 = vmul.f32 %v601_v32, %v601_v32  ;;  %v625_v39 = vsub.f32 %v583_v63, %v601_v32  ;;  %v624_v40 = vsub.f32 %v582_v51, %v601_v32 }
 0x268   :  { %v626_v41 = vsub.f32 %v584_v59, %v601_v32  ;;  %v623_v42 = vsub.f32 %v581_v53, %v601_v32  ;;  %v656_v53 = vld [vmem:[#allocation10 + $0x18] sm:$0xff]  ;;  %v655_v59 = vld [vmem:[#allocation10 + $0x10] sm:$0xff] }
 0x269   :  { %v621_v36 = vsub.f32 %v619_v34, %v620_v35 }
 0x26b   :  { %v622_v37 = vmax.f32 %v621_v36, 0.0 }
 0x26d   :  { %v627_v38 = vadd.f32 1e-05, %v622_v37 }
 0x26f   :  { %2062 = vrsqrt.f32 %v627_v38 }
 0x27c   :  { %v2063_v43 = vpop.eup %2062 }
 0x27d   :  { %v631_v45 = vmul.f32 %v2063_v43, %v625_v39  ;;  %v630_v46 = vmul.f32 %v2063_v43, %v624_v40  ;;  %v632_v47 = vmul.f32 %v2063_v43, %v626_v41  ;;  %v629_v48 = vmul.f32 %v2063_v43, %v623_v42 }
 0x27f   :  { %v640_v50 = vmul.f32 %v1738_v44, %v630_v46  ;;  %v642_v52 = vmul.f32 %v1738_v44, %v632_v47  ;;  %v639_v54 = vmul.f32 %v1738_v44, %v629_v48  ;;  %v641_v55 = vmul.f32 %v1738_v44, %v631_v45 }
 0x281   :  { %v2654_v56 = vadd.f32 %v1739_v49, %v640_v50  ;;  %v2656_v57 = vadd.f32 %v1739_v49, %v642_v52  ;;  %v2658_v58 = vadd.f32 %v1739_v49, %v639_v54  ;;  %v2663_v51 = vadd.f32 %v1739_v49, %v641_v55 }
 0x283   :  { %1903 = vmatprep.subr.mxu0 %v2656_v57  ;;  %1925 = vmatprep.mubr.msk.f32.mxu1 %vm251_vm0, %v2658_v58 }
 0x284   :  { %1904 = vmatpush3.msra.mxu0 %v2656_v57  ;;  %1926 = vmatmul.mubr.msk.f32.vlgmr.msra.gmra.mxu1 %vm251_vm0, %v2654_v56 }
 0x285   :  { %1905 = vmatprep.subr.mxu0 %v2663_v51  ;;  %1928 = vmatprep.mubr.msk.f32.mxu1 %vm251_vm0, %v2663_v51 }
 0x286   :  { %1906 = vmatpush3.msra.mxu0 %v2663_v51 }
 0x287   :  { %1907 = vmatprep.subr.mxu0 %v2654_v56 }
 0x288   :  { %1908 = vmatpush3.msra.mxu0 %v2654_v56  ;;  %1929 = vmatmul.mubr.msk.f32.gmra.mxu1 %vm251_vm0, %v2656_v57 }
 0x289   :  { %1909 = vmatprep.subr.mxu0 %v2658_v58  ;;  %1953 = vmatprep.mubr.msk.f32.mxu1 %vm251_vm0, %v2582_v2  ;;  %v653_v2 = vld [vmem:[#allocation10] sm:$0xff] }
 0x28a   :  { %1910 = vmatpush3.msra.mxu0 %v2658_v58 }
 0x28b   :  { %1912 = vmatmul.mubr.msk.f32.vlgmr.msra.gmra.mxu0 %vm251_vm0, %v2599_v6  ;;  %1931 = vmatprep.subr.mxu0 %v656_v53 }
 0x28c   :  { %1914 = vmatprep.mubr.msk.f32.mxu0 %vm251_vm0, %v2592_v4  ;;  %1932 = vmatpush3.msra.mxu0 %v656_v53 }
 0x28d   :  { %1933 = vmatprep.subr.mxu0 %v655_v59 }
 0x28e   :  { %1934 = vmatpush3.msra.mxu0 %v655_v59 }
 0x28f   :  { %1915 = vmatmul.mubr.msk.f32.gmra.mxu0 %vm251_vm0, %v2609_v9  ;;  %1935 = vmatprep.subr.mxu0 %v654_v60 }
 0x290   :  { %1936 = vmatpush3.msra.mxu0 %v654_v60 }
 0x291   :  { %1937 = vmatprep.subr.mxu0 %v653_v2 }
 0x292   :  { %1938 = vmatpush3.msra.mxu0 %v653_v2 }
 0x293   :  { %1959 = vmatprep.subr.mxu0 %v1033_v8 }
 0x344   :  { %v1927_v14 = vpop.f32.mrf.mxu1 }
 0x346   :  { %v829_v15 = vpop.f32.mrf.mxu1 }
 0x348   :  { %v1930_v20 = vpop.f32.mrf.mxu1 }
 0x34a   :  { %v839_v32 = vpop.f32.mrf.mxu1 }
 0x34b   :  { %v1913_v61 = vpop.f32.mrf.mxu0 }
 0x34c   :  { %v748_v0 = vmul.f32 %v2627_v23, %v1913_v61 }
 0x34d   :  { %v728_v62 = vpop.f32.mrf.mxu0 }
 0x34e   :  { %v747_v63 = vmul.f32 %v2629_v24, %v728_v62 }
 0x34f   :  { %v1916_v1 = vpop.f32.mrf.mxu0 }
 0x350   :  { %1939 = vmatprep.mubr.msk.f32.mxu0 %vm251_vm0, %v747_v63  ;;  %v750_v7 = vmul.f32 %v2633_v29, %v1916_v1 }
 0x351   :  { %v738_v3 = vpop.f32.mrf.mxu0  ;;  %1940 = vmatmul.mubr.msk.f32.vlgmr.msra.gmra.mxu0 %vm251_vm0, %v748_v0 }
 0x352   :  { %v749_v5 = vmul.f32 %v2636_v30, %v738_v3  ;;  %1960 = vmatpush3.msra.mxu0 %v1033_v8 }
 0x353   :  { %1961 = vmatprep.subr.mxu0 %v1032_v10 }
 0x354   :  { %1942 = vmatprep.mubr.msk.f32.mxu0 %vm251_vm0, %v749_v5  ;;  %1962 = vmatpush3.msra.mxu0 %v1032_v10 }
 0x355   :  { %1943 = vmatmul.mubr.msk.f32.gmra.mxu0 %vm251_vm0, %v750_v7  ;;  %1963 = vmatprep.subr.mxu0 %v1031_v11 }
 0x356   :  { %1964 = vmatpush3.msra.mxu0 %v1031_v11 }
 0x357   :  { %1965 = vmatprep.subr.mxu0 %v1030_v12 }
 0x358   :  { %1966 = vmatpush3.msra.mxu0 %v1030_v12 }
 0x359   :  { %1987 = vmatprep.subr.mxu0 %v2694_v13 }
 0x411   :  { %v1941_v17 = vpop.f32.mrf.mxu0 }
 0x412   :  { %v932_v18 = vadd.f32 %v1941_v17, %v1927_v14 }
 0x413   :  { %v926_v19 = vpop.f32.mrf.mxu0 }
 0x414   :  { %v952_v21 = vadd.f32 %v1752_v16, %v932_v18  ;;  %v927_v22 = vadd.f32 %v926_v19, %v829_v15 }
 0x415   :  { %v1944_v25 = vpop.f32.mrf.mxu0 }
 0x416   :  { %v951_v26 = vadd.f32 %v1752_v16, %v927_v22  ;;  %v942_v27 = vadd.f32 %v1944_v25, %v1930_v20  ;;  %v956_v28 = vmax.f32 %v952_v21, 0.0 }
 0x417   :  { %v936_v31 = vpop.f32.mrf.mxu0 }
 0x418   :  { %v955_v33 = vmax.f32 %v951_v26, 0.0  ;;  %v954_v34 = vadd.f32 %v1752_v16, %v942_v27  ;;  %v937_v35 = vadd.f32 %v936_v31, %v839_v32  ;;  %v976_v37 = vmul.f32 %v956_v28, %v956_v28  ;;  %v1753_v26 = vld [vmem:[#allocation14] ss:$0 sm:$0xff] }
 0x419   :  { %v962_v41 = vsel %vm251_vm0, %v956_v28, 0.0 }
 0x41a   :  { %v975_v36 = vmul.f32 %v955_v33, %v955_v33  ;;  %v961_v38 = vsel %vm251_vm0, %v955_v33, 0.0  ;;  %v958_v39 = vmax.f32 %v954_v34, 0.0  ;;  %v953_v40 = vadd.f32 %v1752_v16, %v937_v35  ;;  %v1754_v35 = vld [vmem:[#allocation16] ss:$0 sm:$0xff] }
 0x41b   :  { %v963_v44 = vadd.f32 %v962_v41, %v961_v38  ;;  %v980_v45 = vsel %vm251_vm0, %v976_v37, 0.0 }
 0x41c   :  { %v979_v42 = vsel %vm251_vm0, %v975_v36, 0.0  ;;  %v957_v43 = vmax.f32 %v953_v40, 0.0  ;;  %v978_v46 = vmul.f32 %v958_v39, %v958_v39  ;;  %v966_v52 = vsel %vm251_vm0, %v958_v39, 0.0 }
 0x41d   :  { %v981_v49 = vadd.f32 %v980_v45, %v979_v42  ;;  %v1028_v45 = vld [vmem:[#allocation17 + $0x10] sm:$0xff] }
 0x41e   :  { %v964_v47 = vsel %vm251_vm0, %v957_v43, 0.0  ;;  %v977_v48 = vmul.f32 %v957_v43, %v957_v43  ;;  %v984_v59 = vsel %vm251_vm0, %v978_v46, 0.0  ;;  %v1026_v46 = vld [vmem:[#allocation17] sm:$0xff] }
 0x41f   :  { %v965_v50 = vadd.f32 %v964_v47, %v963_v44 }
 0x420   :  { %v982_v54 = vsel %vm251_vm0, %v977_v48, 0.0 }
 0x421   :  { %v967_v55 = vadd.f32 %v966_v52, %v965_v50  ;;  %v983_v53 = vadd.f32 %v982_v54, %v981_v49  ;;  %v1401_v52 = vld [vmem:[%s2796_s17 + $0x10] sm:$0xff] }
 0x423   :  { %v968_v60 = vrot.slane %v967_v55, 4  ;;  %v985_v2 = vadd.f32 %v984_v59, %v983_v53  ;;  %v1400_v53 = vld [vmem:[%s2796_s17 + $0x8] sm:$0xff] }
 0x424   :  { %v1578_v59 = vld [vmem:[#allocation23 + $0x8] sm:$0xff] }
 0x425   :  { %v969_v61 = vadd.f32 %v968_v60, %v967_v55  ;;  %v986_v62 = vrot.slane %v985_v2, 4 }
 0x427   :  { %v970_v63 = vrot.slane %v969_v61, 2  ;;  %v987_v0 = vadd.f32 %v986_v62, %v985_v2 }
 0x429   :  { %v971_v1 = vadd.f32 %v970_v63, %v969_v61  ;;  %v988_v3 = vrot.slane %v987_v0, 2 }
 0x42b   :  { %v972_v5 = vrot.slane %v971_v1, 1  ;;  %v989_v7 = vadd.f32 %v988_v3, %v987_v0 }
 0x42d   :  { %v973_v8 = vadd.f32 %v972_v5, %v971_v1  ;;  %v990_v10 = vrot.slane %v989_v7, 1 }
 0x42f   :  { %v974_v11 = vmul.f32 0.03125, %v973_v8  ;;  %v991_v12 = vadd.f32 %v990_v10, %v989_v7 }
 0x431   :  { %v992_v14 = vmul.f32 0.03125, %v991_v12  ;;  %v993_v15 = vmul.f32 %v974_v11, %v974_v11  ;;  %v998_v19 = vsub.f32 %v957_v43, %v974_v11  ;;  %v997_v20 = vsub.f32 %v956_v28, %v974_v11  ;;  %v1403_v43 = vld [vmem:[#allocation22] sm:$0xff] }
 0x432   :  { %v999_v21 = vsub.f32 %v958_v39, %v974_v11  ;;  %v996_v22 = vsub.f32 %v955_v33, %v974_v11  ;;  %v1405_v33 = vld [vmem:[#allocation22 + $0x10] sm:$0xff]  ;;  %v1404_v39 = vld [vmem:[#allocation22 + $0x8] sm:$0xff] }
 0x433   :  { %v994_v16 = vsub.f32 %v992_v14, %v993_v15 }
 0x435   :  { %v995_v17 = vmax.f32 %v994_v16, 0.0 }
 0x437   :  { %v1000_v18 = vadd.f32 1e-05, %v995_v17 }
 0x439   :  { %2064 = vrsqrt.f32 %v1000_v18 }
 0x446   :  { %v2065_v25 = vpop.eup %2064 }
 0x447   :  { %v1004_v27 = vmul.f32 %v2065_v25, %v998_v19  ;;  %v1003_v31 = vmul.f32 %v2065_v25, %v997_v20  ;;  %v1005_v32 = vmul.f32 %v2065_v25, %v999_v21  ;;  %v1002_v34 = vmul.f32 %v2065_v25, %v996_v22 }
 0x449   :  { %v1013_v36 = vmul.f32 %v1753_v26, %v1003_v31  ;;  %v1015_v37 = vmul.f32 %v1753_v26, %v1005_v32  ;;  %v1012_v38 = vmul.f32 %v1753_v26, %v1002_v34  ;;  %v1014_v40 = vmul.f32 %v1753_v26, %v1004_v27 }
 0x44b   :  { %v1023_v41 = vadd.f32 %v1754_v35, %v1013_v36  ;;  %v1025_v42 = vadd.f32 %v1754_v35, %v1015_v37  ;;  %v1022_v44 = vadd.f32 %v1754_v35, %v1012_v38  ;;  %v1024_v28 = vadd.f32 %v1754_v35, %v1014_v40 }
 0x44d   :  { %1945 = vmatprep.subr.mxu1 %v1025_v42  ;;  %1967 = vmatprep.mubr.msk.f32.mxu0 %vm251_vm0, %v1022_v44 }
 0x44e   :  { %1946 = vmatpush3.msra.mxu1 %v1025_v42  ;;  %1968 = vmatmul.mubr.msk.f32.vlgmr.msra.gmra.mxu0 %vm251_vm0, %v1023_v41 }
 0x44f   :  { %1947 = vmatprep.subr.mxu1 %v1024_v28  ;;  %1970 = vmatprep.mubr.msk.f32.mxu0 %vm251_vm0, %v1024_v28 }
 0x450   :  { %1988 = vmatpush3.msra.mxu0 %v2694_v13  ;;  %1948 = vmatpush3.msra.mxu1 %v1024_v28  ;;  %v1029_v13 = vld [vmem:[#allocation17 + $0x18] sm:$0xff] }
 0x451   :  { %1989 = vmatprep.subr.mxu0 %v1405_v33  ;;  %1949 = vmatprep.subr.mxu1 %v1023_v41 }
 0x452   :  { %1990 = vmatpush3.msra.mxu0 %v1405_v33  ;;  %1950 = vmatpush3.msra.mxu1 %v1023_v41 }
 0x453   :  { %1971 = vmatmul.mubr.msk.f32.gmra.mxu0 %vm251_vm0, %v1025_v42  ;;  %1991 = vmatprep.subr.mxu0 %v1404_v39 }
 0x454   :  { %1951 = vmatprep.subr.mxu1 %v1022_v44  ;;  %1992 = vmatpush3.msra.mxu0 %v1404_v39 }
 0x455   :  { %1995 = vmatprep.mubr.msk.f32.mxu0 %vm251_vm0, %v1022_v44  ;;  %1952 = vmatpush3.msra.mxu1 %v1022_v44 }
 0x456   :  { %1993 = vmatprep.subr.mxu0 %v1403_v43  ;;  %1954 = vmatmul.mubr.msk.f32.vlgmr.msra.gmra.mxu1 %vm251_vm0, %v2599_v6  ;;  %v1027_v6 = vld [vmem:[#allocation17 + $0x8] sm:$0xff] }
 0x457   :  { %1994 = vmatpush3.msra.mxu0 %v1403_v43  ;;  %1956 = vmatprep.mubr.msk.f32.mxu1 %vm251_vm0, %v2592_v4  ;;  %v1402_v4 = vld [vmem:[%s2796_s17 + $0x18] sm:$0xff] }
 0x458   :  { %1996 = vmatmul.mubr.msk.f32.vlgmr.msra.gmra.mxu0 %vm251_vm0, %v1023_v41  ;;  %1973 = vmatprep.subr.mxu1 %v1029_v13 }
 0x459   :  { %1998 = vmatprep.mubr.msk.f32.mxu0 %vm251_vm0, %v1024_v28  ;;  %1974 = vmatpush3.msra.mxu1 %v1029_v13 }
 0x45a   :  { %1957 = vmatmul.mubr.msk.f32.gmra.mxu1 %vm251_vm0, %v2609_v9  ;;  %1975 = vmatprep.subr.mxu1 %v1028_v45 }
 0x45b   :  { %1976 = vmatpush3.msra.mxu1 %v1028_v45 }
 0x45c   :  { %1999 = vmatmul.mubr.msk.f32.gmra.mxu0 %vm251_vm0, %v1025_v42  ;;  %1977 = vmatprep.subr.mxu1 %v1027_v6 }
 0x45d   :  { %1978 = vmatpush3.msra.mxu1 %v1027_v6 }
 0x45e   :  { %1979 = vmatprep.subr.mxu1 %v1026_v46 }
 0x45f   :  { %1980 = vmatpush3.msra.mxu1 %v1026_v46 }
 0x460   :  { %2001 = vmatprep.subr.mxu1 %v1402_v4 }
 0x516   :  { %v1955_v9 = vpop.f32.mrf.mxu1 }
 0x517   :  { %v1121_v49 = vmul.f32 %v2627_v23, %v1955_v9  ;;  %v1399_v23 = vld [vmem:[%s2796_s17] sm:$0xff] }
 0x518   :  { %v1101_v47 = vpop.f32.mrf.mxu1 }
 0x519   :  { %v1120_v48 = vmul.f32 %v2629_v24, %v1101_v47 }
 0x51a   :  { %v1958_v50 = vpop.f32.mrf.mxu1 }
 0x51b   :  { %1981 = vmatprep.mubr.msk.f32.mxu1 %vm251_vm0, %v1120_v48  ;;  %v1123_v24 = vmul.f32 %v2633_v29, %v1958_v50  ;;  %v1580_v29 = vld [vmem:[#allocation23 + $0x18] sm:$0xff] }
 0x51c   :  { %v1111_v54 = vpop.f32.mrf.mxu1  ;;  %1982 = vmatmul.mubr.msk.f32.vlgmr.msra.gmra.mxu1 %vm251_vm0, %v1121_v49  ;;  %2015 = vmatprep.subr.mxu0 %v1580_v29 }
 0x51d   :  { %v1122_v55 = vmul.f32 %v2636_v30, %v1111_v54  ;;  %2002 = vmatpush3.msra.mxu1 %v1402_v4  ;;  %2016 = vmatpush3.msra.mxu0 %v1580_v29  ;;  %v1579_v30 = vld [vmem:[#allocation23 + $0x10] sm:$0xff] }
 0x51e   :  { %2003 = vmatprep.subr.mxu1 %v1401_v52  ;;  %2017 = vmatprep.subr.mxu0 %v1579_v30 }
 0x51f   :  { %1984 = vmatprep.mubr.msk.f32.mxu1 %vm251_vm0, %v1122_v55  ;;  %2004 = vmatpush3.msra.mxu1 %v1401_v52 }
 0x520   :  { %1985 = vmatmul.mubr.msk.f32.gmra.mxu1 %vm251_vm0, %v1123_v24  ;;  %2005 = vmatprep.subr.mxu1 %v1400_v53 }
 0x521   :  { %2006 = vmatpush3.msra.mxu1 %v1400_v53  ;;  %2009 = vmatprep.mubr.msk.f32.mxu1 %vm251_vm0, %v2658_v58  ;;  %v1577_v58 = vld [vmem:[#allocation23] sm:$0xff] }
 0x522   :  { %2007 = vmatprep.subr.mxu1 %v1399_v23  ;;  %2018 = vmatpush3.msra.mxu0 %v1579_v30 }
 0x523   :  { %2008 = vmatpush3.msra.mxu1 %v1399_v23  ;;  %2019 = vmatprep.subr.mxu0 %v1578_v59 }
 0x524   :  { %2010 = vmatmul.mubr.msk.f32.vlgmr.msra.gmra.mxu1 %vm251_vm0, %v2654_v56  ;;  %2029 = vmatprep.subr.mxu1 %v1580_v29  ;;  %v1969_v56 = vpop.f32.mrf.mxu0 }
 0x525   :  { %2012 = vmatprep.mubr.msk.f32.mxu1 %vm251_vm0, %v2663_v51  ;;  %2033 = vmatpush3.msra.mxu1 %v1580_v29  ;;  %v1767_v51 = vld [vmem:[#allocation20] ss:$0 sm:$0xff] }
 0x526   :  { %2030 = vmatprep.subr.mxu1 %v1579_v30  ;;  %2020 = vmatpush3.msra.mxu0 %v1578_v59 }
 0x527   :  { %2034 = vmatpush3.msra.mxu1 %v1579_v30  ;;  %2021 = vmatprep.subr.mxu0 %v1577_v58 }
 0x528   :  { %2013 = vmatmul.mubr.msk.f32.gmra.mxu1 %vm251_vm0, %v2656_v57  ;;  %2031 = vmatprep.subr.mxu1 %v1578_v59  ;;  %v1202_v57 = vpop.f32.mrf.mxu0 }
 0x529   :  { %2035 = vmatpush3.msra.mxu1 %v1578_v59  ;;  %2022 = vmatpush3.msra.mxu0 %v1577_v58  ;;  %v1768_v59 = vld [vmem:[%s2794_s15] ss:$0 sm:$0xff] }
 0x52a   :  { %2032 = vmatprep.subr.mxu1 %v1577_v58  ;;  %v1972_v62 = vpop.f32.mrf.mxu0 }
 0x52b   :  { %2036 = vmatpush3.msra.mxu1 %v1577_v58 }
 0x52c   :  { %v1212_v10 = vpop.f32.mrf.mxu0 }
 0x5dc   :  { %v1983_v60 = vpop.f32.mrf.mxu1 }
 0x5dd   :  { %v1305_v2 = vadd.f32 %v1983_v60, %v1969_v56  ;;  %v1769_v60 = vld [vmem:[%s2795_s16] ss:$0 sm:$0xff] }
 0x5de   :  { %v1299_v61 = vpop.f32.mrf.mxu1 }
 0x5df   :  { %v1325_v63 = vadd.f32 %v1767_v51, %v1305_v2  ;;  %v1300_v0 = vadd.f32 %v1299_v61, %v1202_v57 }
 0x5e0   :  { %v1986_v1 = vpop.f32.mrf.mxu1 }
 0x5e1   :  { %v1324_v3 = vadd.f32 %v1767_v51, %v1300_v0  ;;  %v1315_v5 = vadd.f32 %v1986_v1, %v1972_v62  ;;  %v1329_v7 = vmax.f32 %v1325_v63, 0.0 }
 0x5e2   :  { %v1309_v8 = vpop.f32.mrf.mxu1 }
 0x5e3   :  { %v1328_v11 = vmax.f32 %v1324_v3, 0.0  ;;  %v1327_v12 = vadd.f32 %v1767_v51, %v1315_v5  ;;  %v1310_v14 = vadd.f32 %v1309_v8, %v1212_v10  ;;  %v1349_v16 = vmul.f32 %v1329_v7, %v1329_v7 }
 0x5e4   :  { %v1335_v20 = vsel %vm251_vm0, %v1329_v7, 0.0  ;;  %v2011_v8 = vpop.f32.mrf.mxu1 }
 0x5e5   :  { %v1348_v15 = vmul.f32 %v1328_v11, %v1328_v11  ;;  %v1334_v17 = vsel %vm251_vm0, %v1328_v11, 0.0  ;;  %v1331_v18 = vmax.f32 %v1327_v12, 0.0  ;;  %v1326_v19 = vadd.f32 %v1767_v51, %v1310_v14 }
 0x5e6   :  { %v1336_v25 = vadd.f32 %v1335_v20, %v1334_v17  ;;  %v1353_v26 = vsel %vm251_vm0, %v1349_v16, 0.0  ;;  %v1782_v20 = vld [vmem:[%s2799_s20] ss:$0 sm:$0xff]  ;;  %s2348_s20 = scalar_lea.vmem %s1707_s24, 512 }
 0x5e7   :  { %v1352_v21 = vsel %vm251_vm0, %v1348_v15, 0.0  ;;  %v1330_v22 = vmax.f32 %v1326_v19, 0.0  ;;  %v1351_v27 = vmul.f32 %v1331_v18, %v1331_v18  ;;  %v1339_v36 = vsel %vm251_vm0, %v1331_v18, 0.0  ;;  %p2349_p0 = scmp.ne.s32.totalorder %s1707_s24, %s2348_s20  ;;  %p2354_p2 = scmp.lt.s32.totalorder %s2348_s20, %s2348_s20 }
 0x5e8   :  { %v1354_v34 = vadd.f32 %v1353_v26, %v1352_v21 }
 0x5e9   :  { %v1337_v31 = vsel %vm251_vm0, %v1330_v22, 0.0  ;;  %v1350_v32 = vmul.f32 %v1330_v22, %v1330_v22  ;;  %v1357_v41 = vsel %vm251_vm0, %v1351_v27, 0.0  ;;  %p2355_p3 = por %p2354_p2, %p2353_p1 }
 0x5ea   :  { %v1338_v35 = vadd.f32 %v1337_v31, %v1336_v25 }
 0x5eb   :  { %v1355_v37 = vsel %vm251_vm0, %v1350_v32, 0.0  ;;  %p2356_p4 = pnand %p2355_p3, %p2349_p0 }
 0x5ec   :  { %v1340_v38 = vadd.f32 %v1339_v36, %v1338_v35  ;;  %v1356_v40 = vadd.f32 %v1355_v37, %v1354_v34 }
 0x5ee   :  { %v1341_v42 = vrot.slane %v1340_v38, 4  ;;  %v1358_v44 = vadd.f32 %v1357_v41, %v1356_v40 }
 0x5f0   :  { %v1342_v28 = vadd.f32 %v1341_v42, %v1340_v38  ;;  %v1359_v33 = vrot.slane %v1358_v44, 4 }
 0x5f2   :  { %v1343_v39 = vrot.slane %v1342_v28, 2  ;;  %v1360_v43 = vadd.f32 %v1359_v33, %v1358_v44 }
 0x5f4   :  { %v1344_v13 = vadd.f32 %v1343_v39, %v1342_v28  ;;  %v1361_v45 = vrot.slane %v1360_v43, 2 }
 0x5f6   :  { %v1345_v6 = vrot.slane %v1344_v13, 1  ;;  %v1362_v46 = vadd.f32 %v1361_v45, %v1360_v43 }
 0x5f8   :  { %v1346_v4 = vadd.f32 %v1345_v6, %v1344_v13  ;;  %v1363_v9 = vrot.slane %v1362_v46, 1 }
 0x5fa   :  { %v1347_v47 = vmul.f32 0.03125, %v1346_v4  ;;  %v1364_v48 = vadd.f32 %v1363_v9, %v1362_v46 }
 0x5fc   :  { %v1365_v49 = vmul.f32 0.03125, %v1364_v48  ;;  %v1366_v50 = vmul.f32 %v1347_v47, %v1347_v47  ;;  %v1371_v53 = vsub.f32 %v1330_v22, %v1347_v47  ;;  %v1369_v24 = vsub.f32 %v1328_v11, %v1347_v47  ;;  %v1558_v11 = vpop.f32.mrf.mxu1 }
 0x5fd   :  { %v1370_v23 = vsub.f32 %v1329_v7, %v1347_v47  ;;  %v1372_v29 = vsub.f32 %v1331_v18, %v1347_v47  ;;  %v1997_v7 = vpop.f32.mrf.mxu0 }
 0x5fe   :  { %v1367_v52 = vsub.f32 %v1365_v49, %v1366_v50  ;;  %v2014_v14 = vpop.f32.mrf.mxu1  ;;  %v1564_v17 = vadd.f32 %v2011_v8, %v1997_v7 }
 0x5ff   :  { %v1473_v10 = vpop.f32.mrf.mxu0 }
 0x600   :  { %v1368_v54 = vmax.f32 %v1367_v52, 0.0  ;;  %v1568_v16 = vpop.f32.mrf.mxu1  ;;  %v1559_v22 = vadd.f32 %v1558_v11, %v1473_v10 }
 0x601   :  { %v2000_v12 = vpop.f32.mrf.mxu0 }
 0x602   :  { %v1373_v55 = vadd.f32 1e-05, %v1368_v54  ;;  %v1574_v18 = vadd.f32 %v2014_v14, %v2000_v12 }
 0x603   :  { %v1483_v15 = vpop.f32.mrf.mxu0 }
 0x604   :  { %2066 = vrsqrt.f32 %v1373_v55  ;;  %v1569_v25 = vadd.f32 %v1568_v16, %v1483_v15 }
 0x611   :  { %v2067_v30 = vpop.eup %2066 }
 0x612   :  { %v1377_v58 = vmul.f32 %v2067_v30, %v1371_v53  ;;  %v1375_v56 = vmul.f32 %v2067_v30, %v1369_v24  ;;  %v1376_v57 = vmul.f32 %v2067_v30, %v1370_v23  ;;  %v1378_v51 = vmul.f32 %v2067_v30, %v1372_v29 }
 0x614   :  { %v1385_v2 = vmul.f32 %v1768_v59, %v1375_v56  ;;  %v1386_v61 = vmul.f32 %v1768_v59, %v1376_v57  ;;  %v1388_v62 = vmul.f32 %v1768_v59, %v1378_v51  ;;  %v1387_v63 = vmul.f32 %v1768_v59, %v1377_v58 }
 0x616   :  { %v1395_v0 = vadd.f32 %v1769_v60, %v1385_v2  ;;  %v1396_v1 = vadd.f32 %v1769_v60, %v1386_v61  ;;  %v1398_v3 = vadd.f32 %v1769_v60, %v1388_v62  ;;  %v1397_v5 = vadd.f32 %v1769_v60, %v1387_v63 }
 0x618   :  { %2023 = vmatprep.mubr.msk.f32.mxu0 %vm251_vm0, %v1395_v0  ;;  %2026 = vmatprep.mubr.msk.f32.mxu1 %vm251_vm0, %v1397_v5 }
 0x619   :  { %2024 = vmatmul.mubr.msk.f32.vlgmr.msra.gmra.mxu0 %vm251_vm0, %v1396_v1  ;;  %2027 = vmatmul.mubr.msk.f32.vlgmr.msra.gmra.mxu1 %vm251_vm0, %v1398_v3 }
 0x6d9   :  { %v2025_v19 = vpop.f32.mrf.mxu0  ;;  %v2028_v21 = vpop.f32.mrf.mxu1 }
 0x6da   :  { %v1679_v26 = vadd.f32 %v2025_v19, %v1564_v17  ;;  %v1681_v27 = vadd.f32 %v2028_v21, %v1574_v18 }
 0x6db   :  { %v1659_v31 = vpop.f32.mrf.mxu0  ;;  %v1669_v32 = vpop.f32.mrf.mxu1 }
 0x6dc   :  { %v1690_v34 = vadd.f32 %v1782_v20, %v1679_v26  ;;  %v1692_v35 = vadd.f32 %v1782_v20, %v1681_v27  ;;  %v1678_v36 = vadd.f32 %v1659_v31, %v1559_v22  ;;  %v1680_v37 = vadd.f32 %v1669_v32, %v1569_v25 }
 0x6de   :  { %v1694_v38 = vmax.f32 %v1690_v34, 0.0  ;;  %v1696_v40 = vmax.f32 %v1692_v35, 0.0  ;;  %v1689_v41 = vadd.f32 %v1782_v20, %v1678_v36  ;;  %v1691_v42 = vadd.f32 %v1782_v20, %v1680_v37 }
 0x6e0   :  { %1698 = vst.msk [vmem:[#allocation25 + $0x8] sm:$0xff] %vm251_vm0, %v1694_v38  ;;  %1700 = vst.msk [vmem:[#allocation25 + $0x18] sm:$0xff] %vm251_vm0, %v1696_v40  ;;  %v1693_v44 = vmax.f32 %v1689_v41, 0.0  ;;  %v1695_v28 = vmax.f32 %v1691_v42, 0.0 }
 0x6e2   :  { %1697 = vst.msk [vmem:[#allocation25] sm:$0xff] %vm251_vm0, %v1693_v44  ;;  %1699 = vst.msk [vmem:[#allocation25 + $0x10] sm:$0xff] %vm251_vm0, %v1695_v28 }
 0x6e3   :  { %2359 = shalt.err (!%p2356_p4)
}
 0x6e4   :  { %1712 = dma.vmem_to_hbm [thread:$0]  %s1707_s24, 512, %s2800_s21, [#allocation4], %s2390_s25, %s2390_s25, %s2391_s3  }
 0x6e5   :  { %2384 = dma.done.wait [#allocation4], 512  }
 0x6e6   :  { %2385 = vsyncadd [#allocation4], 4294966784 }
 0x6e7   :  { %1716 = vsyncpa [#allocation3], 1 }
 0x6e8   :  { %1717 = vsyncpa [#allocation6], 1 }
 0x6e9   :  { %1718 = vsyncpa [#allocation9], 1 }
 0x6ea   :  { %1719 = vsyncpa [#allocation12], 1 }
 0x6eb   :  { %1720 = vsyncpa [#allocation15], 1 }
 0x6ec   :  { %1721 = vsyncpa [#allocation18], 1 }
 0x6ed   :  { %1722 = vsyncpa [#allocation21], 1 }
 0x6ee   :  { %1723 = vsyncpa [#allocation24], 1 }
 0x6ef   :  { %1724 = vsyncpa [#allocation4], 1 }

</bundles_post_ra>
